<compile_context>
chip_gen: v7x
topology: tpu7x:2x2x1
jax: 0.10.0
libtpu: 0.0.40
codegen_flags: <defaults>
</compile_context>

<pallas_src>
import jax
import jax.numpy as jnp
from jax import lax
from jax.experimental import pallas as pl
from jax.experimental.pallas import tpu as pltpu

# ---- configuration (small, consistent with the module) ----
B = 2
PLANES = 64            # channels
GROUPS = 32
BRANCHES = 2
REDUCE = 16
HEADS = 4              # MHSA default head count
H = W = 8
N = H * W
LANES = B * N          # batch folded into lanes -> 128-wide slabs
D = PLANES // HEADS
HIDDEN = max(PLANES // REDUCE, 32)
BN_EPS = 1e-5
CPG = PLANES // GROUPS  # channels per group
NEG_INF = -1e30


# ---------------------------------------------------------------------------
# pltpu.roll direction probe (tiny one-off kernel, run once BEFORE tracing the
# fused kernel).  Expected convention: np.roll, i.e. result[i] = x[i - shift].
# The probe makes the tap generation robust if the convention ever differs.
# ---------------------------------------------------------------------------
_ROLL_IS_NUMPY = None


def _probe_roll_convention():
    global _ROLL_IS_NUMPY
    if _ROLL_IS_NUMPY is None:
        def k(x_ref, o_ref):
            o_ref[...] = pltpu.roll(x_ref[...], 1, 1)
        x = jnp.tile(lax.iota(jnp.float32, LANES)[None, :], (8, 1))
        out = pl.pallas_call(
            k, out_shape=jax.ShapeDtypeStruct((8, LANES), jnp.float32))(x)
        _ROLL_IS_NUMPY = bool(out[0, 0] > LANES / 2)
    return _ROLL_IS_NUMPY


def _lane_roll(v, shift):
    """y[:, i] = v[:, (i + shift) % LANES] for a (rows, LANES) value."""
    if shift % LANES == 0:
        return v
    numpy_conv = _ROLL_IS_NUMPY if _ROLL_IS_NUMPY is not None else True
    amt = (-shift) % LANES if numpy_conv else shift % LANES
    return pltpu.roll(v, amt, 1)


# ---------------------------------------------------------------------------
# Fused Pallas kernel
# ---------------------------------------------------------------------------
def sbconv_kernel(x_ref, wd_ref, scale1_ref, bias1_ref,
                  wqkv_ref, bqkv_ref, rel_ref,
                  wfc_ref, scale2_ref, bias2_ref,
                  wfcs2_ref, bfcs2_ref, avg_ref,
                  o_ref, taps_sc, attn_sc):
    """Fused SBConv forward on a lane-dense (C, B*N) layout.

    x_ref:        (C, B*N)   f32   flattened input (lane = b*N + y*W + x)
    wd_ref:       (C, 9C)    bf16  block-diag grouped-conv weight, tap-major cols
    scale1/bias1: (C, 1)     f32   folded BN of the conv branch
    wqkv_ref:     (3C, C)    bf16  stacked 1x1 q/k/v weights
    bqkv_ref:     (3C, 1)    f32   stacked q/k/v biases
    rel_ref:      (heads, d, B*N) bf16 relative-position term, tiled per batch
    wfc_ref:      (hidden, C) bf16 ; scale2/bias2: (hidden, 1) folded BN of fc
    wfcs2_ref:    (2C, hidden) bf16  stacked per-branch 1x1 weights
    bfcs2_ref:    (2C, 1)    f32   stacked per-branch biases
    avg_ref:      (B*N, B)   bf16  per-batch GAP averaging matrix (1/N blocks)
    o_ref:        (C, B*N)   f32   gated output
    taps_sc:      (9C, B*N)  bf16  VMEM scratch, in-kernel 3x3 tap slabs
    attn_sc:      (C, B*N)   f32   VMEM scratch, attention branch output
    """
    xin = x_ref[...]                                    # (C, 128) f32
    x_bf = xin.astype(jnp.bfloat16)

    # hoisted lane-index constants (batch id / spatial row / spatial col)
    lane = lax.broadcasted_iota(jnp.int32, (PLANES, LANES), 1)
    pos = lane % N
    yy = pos // W
    xx = pos % W

    # --- branch 1 inputs: 9 3x3 taps built in VMEM via lane rolls + masks ----
    # tap t = dy*3+dx samples input at (y+dy-1, x+dx-1); roll crosses image /
    # batch boundaries only where the border mask zeroes the value anyway.
    for tap in range(9):
        oy, ox = tap // 3 - 1, tap % 3 - 1
        shifted = _lane_roll(xin, oy * W + ox)
        valid = ((yy + oy >= 0) & (yy + oy < H) &
                 (xx + ox >= 0) & (xx + ox < W))
        taps_sc[tap * PLANES:(tap + 1) * PLANES, :] = (
            jnp.where(valid, shifted, 0.0).astype(jnp.bfloat16))

    # --- branch 2: BoTNet MHSA, both batches paired along the 128-lane axis --
    qkv = jnp.dot(wqkv_ref[...], x_bf, preferred_element_type=jnp.float32)
    qkv_bf = (qkv + bqkv_ref[...]).astype(jnp.bfloat16)     # (3C, 128)

    # additive mask killing cross-batch attention in the (128,128) energy
    same_b = (lax.broadcasted_iota(jnp.int32, (LANES, LANES), 0) // N ==
              lax.broadcasted_iota(jnp.int32, (LANES, LANES), 1) // N)
    cross_mask = jnp.where(same_b, 0.0, NEG_INF).astype(jnp.float32)

    for h in range(HEADS):
        row = h * D
        qh = qkv_bf[row:row + D, :]                          # (d, 128)
        kh = qkv_bf[PLANES + row:PLANES + row + D, :]
        vh = qkv_bf[2 * PLANES + row:2 * PLANES + row + D, :]
        # cc + cp fused in one K=2d contraction:  energy = [q; rel]^T @ [k; q]
        a_op = jnp.concatenate([qh, rel_ref[h]], axis=0)     # (2d, 128)
        b_op = jnp.concatenate([kh, qh], axis=0)             # (2d, 128)
        energy = lax.dot_general(a_op, b_op, (((0,), (0,)), ((), ())),
                                 preferred_element_type=jnp.float32)
        energy = energy + cross_mask                         # (128, 128)
        m = jnp.max(energy, axis=-1, keepdims=True)
        e = jnp.exp(energy - m)
        att = e * pl.reciprocal(jnp.sum(e, axis=-1, keepdims=True),
                                approx=True)
        # out[d, i] = sum_j v[d, j] * att[i, j]  -> full 128-lane store
        oh = lax.dot_general(vh, att.astype(jnp.bfloat16),
                             (((1,), (1,)), ((), ())),
                             preferred_element_type=jnp.float32)
        attn_sc[row:row + D, :] = oh

    # --- branch 1: grouped 3x3 conv as ONE (C,9C)@(9C,128) MXU matmul + BN+ReLU
    acc = jnp.dot(wd_ref[...], taps_sc[...], preferred_element_type=jnp.float32)
    conv_o = jnp.maximum(acc * scale1_ref[...] + bias1_ref[...], 0.0)
    attn_o = attn_sc[...]

    # --- selective-kernel gating (GAP / fc / fcs all as small MXU matmuls) ---
    s = conv_o + attn_o                                      # (C, 128)
    gap = jnp.dot(s.astype(jnp.bfloat16), avg_ref[...],
                  preferred_element_type=jnp.float32)        # (C, B)
    z = jnp.dot(wfc_ref[...], gap.astype(jnp.bfloat16),
                preferred_element_type=jnp.float32)          # (hidden, B)
    z = jnp.maximum(z * scale2_ref[...] + bias2_ref[...], 0.0)
    logits = jnp.dot(wfcs2_ref[...], z.astype(jnp.bfloat16),
                     preferred_element_type=jnp.float32) + bfcs2_ref[...]
    l0 = logits[:PLANES, :]                                  # (C, B) conv branch
    l1 = logits[PLANES:, :]                                  # (C, B) attn branch
    mg = jnp.maximum(l0, l1)
    e0 = jnp.exp(l0 - mg)
    e1 = jnp.exp(l1 - mg)
    w0 = e0 / (e0 + e1)                                      # exact 2-way softmax
    # expand (C, B) gates to (C, B*N) by each lane's batch id (B == 2)
    is_b0 = (lane // N) == 0
    wa = jnp.where(is_b0, w0[:, 0:1], w0[:, 1:2])            # (C, 128)
    o_ref[...] = conv_o * wa + attn_o * (1.0 - wa)           # one 128-lane store


# ---------------------------------------------------------------------------
# Parameter initialization (deterministic, synthetic)
# ---------------------------------------------------------------------------
def init_params(key):
    ks = jax.random.split(key, 24)
    p = {}

    # grouped conv3x3 weight (planes, planes // groups, 3, 3), no bias
    w_conv = jax.random.normal(ks[0], (PLANES, CPG, 3, 3), jnp.float32) * 0.2
    p['w_conv'] = w_conv
    # BN1 (inference mode, folded)
    g1 = 0.5 + jax.random.uniform(ks[1], (PLANES,), jnp.float32)
    b1 = jax.random.normal(ks[2], (PLANES,), jnp.float32) * 0.1
    m1 = jax.random.normal(ks[3], (PLANES,), jnp.float32) * 0.1
    v1 = 0.5 + jax.random.uniform(ks[4], (PLANES,), jnp.float32)
    scale1 = g1 / jnp.sqrt(v1 + BN_EPS)
    bias1 = b1 - m1 * scale1
    p['scale1'] = scale1
    p['bias1'] = bias1

    # dense block-diagonal weight for the grouped conv, flattened tap-major:
    # wd_flat[c_out, t*C + c_in] = w_blockdiag[c_out, c_in, ky, kx], t = ky*3+kx
    w_g = w_conv.reshape(GROUPS, CPG, CPG, 3, 3)
    eye = jnp.eye(GROUPS, dtype=jnp.float32)
    wd_full = jnp.einsum('gh,gabyx->gahbyx', eye, w_g)
    wd_full = wd_full.reshape(PLANES, PLANES, 3, 3)
    wd9 = jnp.transpose(wd_full, (2, 3, 0, 1)).reshape(9, PLANES, PLANES)
    p['wd_flat'] = jnp.transpose(wd9, (1, 0, 2)).reshape(
        PLANES, 9 * PLANES).astype(jnp.bfloat16)

    # MHSA 1x1 q/k/v convs (with bias) + relative position parameters
    wq = jax.random.normal(ks[5], (PLANES, PLANES), jnp.float32) * 0.1
    wk = jax.random.normal(ks[6], (PLANES, PLANES), jnp.float32) * 0.1
    wv = jax.random.normal(ks[7], (PLANES, PLANES), jnp.float32) * 0.1
    bq = jax.random.normal(ks[8], (PLANES,), jnp.float32) * 0.05
    bk = jax.random.normal(ks[9], (PLANES,), jnp.float32) * 0.05
    bv = jax.random.normal(ks[10], (PLANES,), jnp.float32) * 0.05
    p['wq'], p['wk'], p['wv'] = wq, wk, wv
    p['bq'], p['bk'], p['bv'] = bq, bk, bv
    rel_h = jax.random.normal(ks[11], (HEADS, D, 1, H), jnp.float32) * 0.1
    rel_w = jax.random.normal(ks[12], (HEADS, D, W, 1), jnp.float32) * 0.1
    # matches torch: (rel_h + rel_w).view(1, heads, d, -1)
    p['rel'] = (rel_h + rel_w).reshape(HEADS, D, N)
    # tiled over batch along lanes, bf16 MXU operand for the fused cc+cp matmul
    p['rel_tiled'] = jnp.tile(p['rel'], (1, 1, B)).astype(jnp.bfloat16)
    # stacked q/k/v for the fused projection (bf16 MXU operands, f32 biases)
    p['wqkv'] = jnp.concatenate([wq, wk, wv], axis=0).astype(jnp.bfloat16)
    p['bqkv_col'] = jnp.concatenate([bq, bk, bv]).reshape(3 * PLANES, 1)

    # fc: 1x1 conv (hidden, planes) no bias + BN2 (folded) + ReLU
    wfc = jax.random.normal(ks[13], (HIDDEN, PLANES), jnp.float32) * 0.1
    g2 = 0.5 + jax.random.uniform(ks[14], (HIDDEN,), jnp.float32)
    b2 = jax.random.normal(ks[15], (HIDDEN,), jnp.float32) * 0.1
    m2 = jax.random.normal(ks[16], (HIDDEN,), jnp.float32) * 0.1
    v2 = 0.5 + jax.random.uniform(ks[17], (HIDDEN,), jnp.float32)
    scale2 = g2 / jnp.sqrt(v2 + BN_EPS)
    bias2 = b2 - m2 * scale2
    p['wfc'] = wfc
    p['scale2'] = scale2
    p['bias2'] = bias2
    p['wfc_bf16'] = wfc.astype(jnp.bfloat16)

    # fcs: per-branch 1x1 conv (planes, hidden) with bias
    p['wfcs'] = jax.random.normal(ks[18], (BRANCHES, PLANES, HIDDEN),
                                  jnp.float32) * 0.1
    p['bfcs'] = jax.random.normal(ks[19], (BRANCHES, PLANES), jnp.float32) * 0.05
    # stacked (2C, hidden) / (2C, 1) so both branch logits come from one matmul
    p['wfcs2'] = p['wfcs'].reshape(BRANCHES * PLANES, HIDDEN).astype(jnp.bfloat16)
    p['bfcs2_col'] = p['bfcs'].reshape(BRANCHES * PLANES, 1)

    # pre-shaped column views for the kernel
    p['scale1_col'] = scale1.reshape(PLANES, 1)
    p['bias1_col'] = bias1.reshape(PLANES, 1)
    p['scale2_col'] = scale2.reshape(HIDDEN, 1)
    p['bias2_col'] = bias2.reshape(HIDDEN, 1)
    return p


# ---------------------------------------------------------------------------
# Forward pass (minimal host glue + single fused pallas_call)
# ---------------------------------------------------------------------------
def sbconv_forward(x, p):
    bb, c, hh, ww = x.shape
    n = hh * ww
    lanes = bb * n

    # lane-dense flattened input (C, B*N), f32 (taps are generated in-kernel)
    xf = jnp.transpose(x.reshape(bb, c, n), (1, 0, 2)).reshape(c, lanes)

    # per-batch GAP averaging matrix: avg[l, b] = 1/N iff lane l belongs to b
    avg = jnp.where(jnp.arange(lanes)[:, None] // n == jnp.arange(bb)[None, :],
                    1.0 / n, 0.0).astype(jnp.bfloat16)

    flops = (2 * c * (9 * c) * lanes                   # grouped conv matmul
             + 2 * (3 * c) * c * lanes                 # fused q/k/v projection
             + HEADS * 2 * (2 * D) * lanes * lanes     # fused cc+cp energies
             + HEADS * 2 * D * lanes * lanes           # v @ att
             + 2 * c * lanes * bb                      # GAP matmul
             + 2 * HIDDEN * c * bb                     # fc
             + 2 * (BRANCHES * c) * HIDDEN * bb)       # stacked fcs logits
    transcendentals = HEADS * lanes * lanes + HEADS * lanes + BRANCHES * c * bb
    bytes_accessed = (xf.size * 4 + c * lanes * 4
                      + p['wd_flat'].size * 2 + p['wqkv'].size * 2
                      + p['rel_tiled'].size * 2 + p['wfc_bf16'].size * 2
                      + p['wfcs2'].size * 2 + avg.size * 2
                      + (p['scale1_col'].size + p['bias1_col'].size
                         + p['bqkv_col'].size + p['scale2_col'].size
                         + p['bias2_col'].size + p['bfcs2_col'].size) * 4)

    out = pl.pallas_call(
        sbconv_kernel,
        out_shape=jax.ShapeDtypeStruct((c, lanes), jnp.float32),
        grid=(1,),
        in_specs=[
            pl.BlockSpec((c, lanes), lambda i: (0, 0)),             # x
            pl.BlockSpec((c, 9 * c), lambda i: (0, 0)),             # wd_flat
            pl.BlockSpec((c, 1), lambda i: (0, 0)),                 # scale1
            pl.BlockSpec((c, 1), lambda i: (0, 0)),                 # bias1
            pl.BlockSpec((3 * c, c), lambda i: (0, 0)),             # wqkv
            pl.BlockSpec((3 * c, 1), lambda i: (0, 0)),             # bqkv
            pl.BlockSpec((HEADS, D, lanes), lambda i: (0, 0, 0)),   # rel (tiled)
            pl.BlockSpec((HIDDEN, c), lambda i: (0, 0)),            # wfc
            pl.BlockSpec((HIDDEN, 1), lambda i: (0, 0)),            # scale2
            pl.BlockSpec((HIDDEN, 1), lambda i: (0, 0)),            # bias2
            pl.BlockSpec((BRANCHES * c, HIDDEN), lambda i: (0, 0)), # wfcs2
            pl.BlockSpec((BRANCHES * c, 1), lambda i: (0, 0)),      # bfcs2
            pl.BlockSpec((lanes, bb), lambda i: (0, 0)),            # avg
        ],
        out_specs=pl.BlockSpec((c, lanes), lambda i: (0, 0)),
        scratch_shapes=[pltpu.VMEM((9 * c, lanes), jnp.bfloat16),   # 3x3 taps
                        pltpu.VMEM((c, lanes), jnp.float32)],       # attn branch
        compiler_params=pltpu.CompilerParams(
            dimension_semantics=("arbitrary",)),
        cost_estimate=pl.CostEstimate(flops=int(flops),
                                      transcendentals=int(transcendentals),
                                      bytes_accessed=int(bytes_accessed)),
    )(xf, p['wd_flat'], p['scale1_col'], p['bias1_col'],
      p['wqkv'], p['bqkv_col'], p['rel_tiled'],
      p['wfc_bf16'], p['scale2_col'], p['bias2_col'],
      p['wfcs2'], p['bfcs2_col'], avg)

    out = jnp.transpose(out.reshape(c, bb, n), (1, 0, 2))    # back to (B, C, N)
    return out.reshape(bb, c, hh, ww)


# ---------------------------------------------------------------------------
# Pure-JAX reference (for a numerical sanity check)
# ---------------------------------------------------------------------------
def reference_forward(x, p):
    bb, c, hh, ww = x.shape
    n = hh * ww
    # conv branch
    y = lax.conv_general_dilated(x, p['w_conv'], window_strides=(1, 1),
                                 padding=((1, 1), (1, 1)),
                                 dimension_numbers=('NCHW', 'OIHW', 'NCHW'),
                                 feature_group_count=GROUPS)
    y = y * p['scale1'][None, :, None, None] + p['bias1'][None, :, None, None]
    conv_out = jnp.maximum(y, 0.0).reshape(bb, c, n)
    # attention branch
    xf = x.reshape(bb, c, n)
    q = jnp.einsum('oc,bcn->bon', p['wq'], xf) + p['bq'][None, :, None]
    k = jnp.einsum('oc,bcn->bon', p['wk'], xf) + p['bk'][None, :, None]
    v = jnp.einsum('oc,bcn->bon', p['wv'], xf) + p['bv'][None, :, None]
    qh = q.reshape(bb, HEADS, D, n)
    kh = k.reshape(bb, HEADS, D, n)
    vh = v.reshape(bb, HEADS, D, n)
    cc = jnp.einsum('bhdi,bhdj->bhij', qh, kh)
    cp = jnp.einsum('hdi,bhdj->bhij', p['rel'], qh)
    att = jax.nn.softmax(cc + cp, axis=-1)
    attn_out = jnp.einsum('bhdj,bhij->bhdi', vh, att).reshape(bb, c, n)
    # SK gating
    s = conv_out + attn_out
    gap = jnp.mean(s, axis=2)                                  # (B, C)
    z = jnp.einsum('hc,bc->bh', p['wfc'], gap)
    z = jnp.maximum(z * p['scale2'][None, :] + p['bias2'][None, :], 0.0)
    logits = jnp.einsum('kch,bh->bkc', p['wfcs'], z) + p['bfcs'][None, :, :]
    wsel = jax.nn.softmax(logits, axis=1)                      # (B, 2, C)
    out = conv_out * wsel[:, 0, :, None] + attn_out * wsel[:, 1, :, None]
    return out.reshape(bb, c, hh, ww)


if __name__ == "__main__":
    key = jax.random.PRNGKey(0)
    k_param, k_x = jax.random.split(key)
    params = init_params(k_param)
    x = jax.random.normal(k_x, (B, PLANES, H, W), jnp.float32)

    # determine pltpu.roll direction once, before tracing the fused kernel
    _probe_roll_convention()

    fwd = jax.jit(sbconv_forward)
    out = jax.block_until_ready(fwd(x, params))

    ref = jax.block_until_ready(reference_forward(x, params))
    assert out.shape == (B, PLANES, H, W)
    assert bool(jnp.all(jnp.isfinite(out)))
    assert bool(jnp.allclose(out, ref, atol=5e-2, rtol=5e-2)), \
        "Pallas output diverges from JAX reference"
    print("KERNEL_OK")
</pallas_src>

<mosaic_0001>
module attributes {stable_mosaic.version = 11 : i64} {
  func.func @k(%arg0: memref<8x128xf32, #tpu.memory_space<vmem>>, %arg1: memref<8x128xf32, #tpu.memory_space<vmem>>) attributes {dimension_semantics = [], scalar_prefetch = 0 : i64, scratch_operands = 0 : i64, tpu.core_type = #tpu.core_type<tc>} {
    %c0 = arith.constant 0 : index
    %c0_0 = arith.constant 0 : index
    %0 = vector.load %arg0[%c0, %c0_0] : memref<8x128xf32, #tpu.memory_space<vmem>>, vector<8x128xf32>
    %c1_i32 = arith.constant 1 : i32
    %1 = tpu.dynamic_rotate %0 by %c1_i32 dim 1 : vector<8x128xf32>, i32 -> vector<8x128xf32>
    %c0_1 = arith.constant 0 : index
    %c0_2 = arith.constant 0 : index
    %2 = vector.load %arg1[%c0_1, %c0_2] : memref<8x128xf32, #tpu.memory_space<vmem>>, vector<8x128xf32>
    tpu.vector_store %arg1[%c0_1, %c0_2], %1 {strides = array<i32>} : memref<8x128xf32, #tpu.memory_space<vmem>>, vector<8x128xf32>,
    return
  }
}

</mosaic_0001>

<bundles_post_ra>
// kernel: tpu_custom_call.1
= control target key start
LH: loop header
LB: loop body
LE: loop exit
PB: predicated region body
PF: predicated region fallthrough
CT: control target
= control target key end

     0   :  { %6 = vsyncpa [#allocation3], 0  ;;  %s128_s0 = inlined_call_operand.hbm [shape: f32[8,128], index: 0, kind: input, shape index: {}]   ;;  %s129_s1 = inlined_call_operand.hbm [shape: f32[8,128], index: 1, kind: output, shape index: {}]  }
   0x1   :  { %7 = vsyncpa [#allocation4], 0  ;;  %s91_s6 = smov [#allocation2]   ;;  %s43_s10 = scalar_lea.hbm %s128_s0, 128 }
   0x2   :  { %s14_s7 = sshll.u32 %s91_s6, 4  ;;  %p44_p0 = scmp.ne.s32.totalorder %s128_s0, %s43_s10  ;;  %s15_s7 = int_to_ptr.vmem [resolvable:$true] %s14_s7 }
   0x3   :  { %p47_p1 = scmp.lt.u32.totalorder %s43_s10, %s128_s0 }
   0x5   :  { %p49_p2 = pnand %p47_p1, %p44_p0 }
   0x7   :  { %52 = shalt.err (!%p49_p2)
}
   0x8   :  { %s53_s15 = scalar_lea.vmem %s15_s7, 128  ;;  %p58_p4 = scmp.lt.s32.totalorder %s15_s7, %s15_s7 }
   0x9   :  { %p54_p3 = scmp.ne.s32.totalorder %s15_s7, %s53_s15  ;;  %p59_p5 = scmp.lt.s32.totalorder %s53_s15, %s53_s15 }
   0xb   :  { %p60_p6 = por %p59_p5, %p58_p4 }
   0xd   :  { %p61_p7 = pnand %p60_p6, %p54_p3 }
   0xf   :  { %64 = shalt.err (!%p61_p7)
}
  0x10   :  { %17 = dma.hbm_to_vmem [thread:$0]  %s128_s0, 128, %s15_s7, [#allocation3]  }
  0x11   :  { %87 = dma.done.wait [#allocation3], 128  }
  0x12   :  { %88 = vsyncadd [#allocation3], 4294967168  ;;  %v21_v0 = vld [vmem:[#allocation2] sm:$0xff]  ;;  %s92_s18 = smov 1   ;;  %s93_s19 = smov [#allocation5]  }
  0x13   :  { %22 = vrot.lane.b32.xlu0 %v21_v0, %s92_s18  ;;  %s31_s20 = sshll.u32 %s93_s19, 4  ;;  %s32_s20 = int_to_ptr.vmem [resolvable:$true] %s31_s20 }
  0x14   :  { %s65_s21 = scalar_lea.vmem %s32_s20, 128  ;;  %p70_p9 = scmp.lt.s32.totalorder %s32_s20, %s32_s20 }
  0x15   :  { %p66_p8 = scmp.ne.s32.totalorder %s32_s20, %s65_s21  ;;  %p71_p10 = scmp.lt.s32.totalorder %s65_s21, %s65_s21 }
  0x17   :  { %p72_p11 = por %p71_p10, %p70_p9 }
  0x19   :  { %p73_p12 = pnand %p72_p11, %p66_p8 }
  0x85   :  { %v23_v1 = vpop.permute.xlu0 %22 }
  0x86   :  { %24 = vst [vmem:[#allocation5] sm:$0xff] %v23_v1 }
  0x87   :  { %76 = shalt.err (!%p73_p12)
}
  0x88   :  { %s77_s0 = scalar_lea.hbm %s129_s1, 128 }
  0x89   :  { %p78_p13 = scmp.ne.s32.totalorder %s129_s1, %s77_s0  ;;  %p81_p0 = scmp.lt.u32.totalorder %s77_s0, %s129_s1 }
  0x8b   :  { %p83_p1 = pnand %p81_p0, %p78_p13 }
  0x8d   :  { %86 = shalt.err (!%p83_p1)
}
  0x8e   :  { %34 = dma.vmem_to_hbm [thread:$0]  %s32_s20, 128, %s129_s1, [#allocation4]  }
  0x8f   :  { %89 = dma.done.wait [#allocation4], 128  }
  0x90   :  { %90 = vsyncadd [#allocation4], 4294967168 }
  0x91   :  { %38 = vsyncpa [#allocation3], 1 }
  0x92   :  { %39 = vsyncpa [#allocation4], 1 }

</bundles_post_ra>
